<compile_context>
chip_gen: v5e
topology: v5e:2x2
jax: 0.10.0
libtpu: 0.0.40
codegen_flags: <defaults>
</compile_context>

<pallas_src>
import functools

import jax
import jax.numpy as jnp
from jax import lax
from jax.experimental import pallas as pl
from jax.experimental.pallas import tpu as pltpu

ALPHA = 0.5
BETA = 0.1
SOFTPLUS_THRESHOLD = 50.0          # nn.Softplus(beta=1, threshold=50)

DEFAULT_TILE_N = 1024              # multiple of 32 (covers int8 sublane packing)
DEFAULT_TILE_D = 512               # multiple of 128 (lane width)
ROW_CHUNK = 32                     # rows processed per fori_loop step
MIN_ELEMS_FOR_PALLAS = 1 << 18     # below this the fused XLA path wins


def _round_up(x, m):
    return (x + m - 1) // m * m


def _tcbb_kernel(w_ref, sign_ref, diff_ref, out_ref, acc_ref, *,
                 n_rows, tile_n, chunk, mask_rows, unroll):
    """Accumulate sum_n w[n]*softplus(-sign*diff) over one (tile_n, tile_d) tile.

    grid = (D tiles "parallel", N tiles "arbitrary"); N (last axis) is the
    reduction.  acc_ref is an (8, tile_d) f32 VMEM accumulator resident across
    the N steps; the lane-dense (multiple-of-128) output store plus the single
    XLU sublane reduce happen only on the last N step.
    """
    n_step = pl.program_id(1)
    tile_d = acc_ref.shape[1]

    @pl.when(n_step == 0)
    def _():
        acc_ref[...] = jnp.zeros_like(acc_ref)

    if mask_rows:
        # In-bounds rows remaining in this tile (>= tile_n on non-last steps,
        # so the mask degenerates to all-true there).
        rows_valid = n_rows - n_step * tile_n
        row_id = lax.broadcasted_iota(jnp.int32, (chunk, tile_d), 0)  # hoisted

    def chunk_body(c, acc):
        r0 = pl.multiple_of(c * chunk, chunk)
        s = sign_ref[pl.ds(r0, chunk), :].astype(jnp.float32)   # widen in-reg
        d = diff_ref[pl.ds(r0, chunk), :].astype(jnp.float32)   # widen in-reg
        x = -s * d
        # Branch-free numerically stable softplus; for x > ~50, exp(-x)
        # underflows, so this matches nn.Softplus(beta=1, threshold=50).
        # TODO(synk): if a v7x bundle dump shows the single EUP slot binding,
        # replace log1p(exp(.)) with exp + a short log1p polynomial (1 EUP op).
        sp = jnp.maximum(x, 0.0) + jnp.log1p(jnp.exp(-jnp.abs(x)))
        contrib = w_ref[pl.ds(r0, chunk), :] * sp                # (chunk, tile_d)
        if mask_rows:
            # Explicitly zero out-of-bounds tail rows (cannot rely on w == 0:
            # OOB window contents are undefined and 0 * NaN = NaN).
            contrib = jnp.where(row_id < (rows_valid - r0), contrib, 0.0)
        # Fold the chunk's rows onto 8 sublanes with vreg-aligned VPU adds;
        # defer the XLU sublane reduction to once per D tile.
        folded = contrib[0:8, :]
        for g in range(1, chunk // 8):
            folded = folded + contrib[g * 8:(g + 1) * 8, :]
        return acc + folded

    part = lax.fori_loop(0, tile_n // chunk, chunk_body,
                         jnp.zeros((8, tile_d), jnp.float32), unroll=unroll)
    acc_ref[...] += part

    @pl.when(n_step == pl.num_programs(1) - 1)
    def _():
        out_ref[...] = jnp.sum(acc_ref[...], axis=0, keepdims=True)


def _group_weights(labels1, labels2, alpha, beta):
    """Per-row weight = group_scale / group_count; rows of empty groups get 0."""
    l1 = labels1.astype(jnp.int32)
    l2 = labels2.astype(jnp.int32)
    same = l1 == l2
    pp = same & (l1 == 1)          # positive-positive pairs
    nn_ = same & (l1 == 0)         # negative-negative pairs
    pn = jnp.logical_not(same)     # positive-negative pairs

    def gw(mask, scale):
        cnt = jnp.maximum(mask.sum(), 1).astype(jnp.float32)
        return jnp.where(mask, jnp.float32(scale) / cnt, jnp.float32(0.0))

    return gw(pp, alpha) + gw(pn, 1.0 - alpha - beta) + gw(nn_, beta)


def tcbb_loss(diff, labels1, labels2, sign, alpha=ALPHA, beta=BETA,
              tile_n=DEFAULT_TILE_N, tile_d=DEFAULT_TILE_D,
              min_elems_for_pallas=MIN_ELEMS_FOR_PALLAS):
    """Pallas implementation of TCBBLoss.forward. Returns a [D] f32 vector."""
    N, D = diff.shape

    # Tiny problems: pallas_call launch + fixed per-step overhead dominates;
    # the fused pure-JAX path is faster well past a few thousand elements.
    if N * D < min_elems_for_pallas:
        return _tcbb_loss_ref(diff, labels1, labels2, sign, alpha, beta)

    # Tiny [N, 1] per-row weight column (plain-JAX scalar-sized glue).
    w = _group_weights(labels1, labels2, alpha, beta).reshape(N, 1)

    # Keep diff / sign in their native dtypes: no wrapper-side conversion pass
    # over the big N x D arrays; they are widened to f32 in-register in-kernel.
    # NOTE: if sign is integer it must already be in {-1, 0, +1}.
    native = (jnp.float32, jnp.bfloat16, jnp.float16, jnp.int8)
    if diff.dtype not in native:
        diff = diff.astype(jnp.float32)
    if sign.dtype not in native:
        sign = sign.astype(jnp.float32)

    # Tile sizing: sublane packing 32 (covers int8/bf16/f32), lane width 128,
    # clamp to the problem.  No padding of diff/sign: pl.cdiv grids plus the
    # in-kernel tail-row mask handle ragged shapes.
    tile_n = _round_up(max(32, min(tile_n, _round_up(N, 32))), 32)
    d_ru = _round_up(D, 128)
    tile_d = _round_up(max(128, min(tile_d, d_ru)), 128)
    if d_ru > 256:
        # Prefer >= 2 D tiles: the "parallel" D axis is what can shard across
        # the two TensorCores on v7x (keep tiles >= 256 lanes for DMA shape).
        tile_d = min(tile_d, max(256, _round_up(pl.cdiv(D, 2), 128)))

    grid_d = pl.cdiv(D, tile_d)
    grid_n = pl.cdiv(N, tile_n)
    mask_rows = (grid_n * tile_n) != N

    chunk = min(ROW_CHUNK, tile_n)
    n_chunks = tile_n // chunk
    unroll = True if n_chunks <= 4 else 2

    diff_bytes = diff.dtype.itemsize
    sign_bytes = sign.dtype.itemsize
    cost = pl.CostEstimate(
        flops=8 * N * D,
        transcendentals=2 * N * D,
        bytes_accessed=N * D * (diff_bytes + sign_bytes) + N * 4 + D * 4,
    )
    # Double-buffered inputs + output block + accumulator scratch, with headroom.
    need = (2 * tile_n * tile_d * (diff_bytes + sign_bytes)
            + 2 * tile_n * 4 + 4 * tile_d * 4 + 8 * tile_d * 4)
    vmem_limit = int(min(max(need + (8 << 20), 32 << 20), 48 << 20))

    kernel = functools.partial(
        _tcbb_kernel, n_rows=N, tile_n=tile_n, chunk=chunk,
        mask_rows=mask_rows, unroll=unroll)

    out = pl.pallas_call(
        kernel,
        out_shape=jax.ShapeDtypeStruct((1, D), jnp.float32),
        grid=(grid_d, grid_n),                        # reduction (N) axis last
        in_specs=[
            pl.BlockSpec((tile_n, 1), lambda di, ni: (ni, 0)),        # w
            pl.BlockSpec((tile_n, tile_d), lambda di, ni: (ni, di)),  # sign
            pl.BlockSpec((tile_n, tile_d), lambda di, ni: (ni, di)),  # diff
        ],
        out_specs=pl.BlockSpec((1, tile_d), lambda di, ni: (0, di)),
        scratch_shapes=[pltpu.VMEM((8, tile_d), jnp.float32)],
        compiler_params=pltpu.CompilerParams(
            dimension_semantics=("parallel", "arbitrary"),
            vmem_limit_bytes=vmem_limit,
        ),
        cost_estimate=cost,
    )(w, sign, diff)
    return out[0]


def _tcbb_loss_ref(diff, labels1, labels2, sign, alpha=ALPHA, beta=BETA):
    """Pure-JAX reference mirroring the PyTorch forward."""
    diff = diff.astype(jnp.float32)
    sign = sign.astype(jnp.float32)
    l1 = labels1.astype(jnp.int32)
    l2 = labels2.astype(jnp.int32)
    same = l1 == l2
    pp = same & (l1 == 1)
    nn_ = same & (l1 == 0)
    pn = jnp.logical_not(same)

    x = -sign * diff
    sp = jnp.where(x > SOFTPLUS_THRESHOLD, x,
                   jnp.log1p(jnp.exp(jnp.minimum(x, SOFTPLUS_THRESHOLD))))

    def group_term(mask, scale):
        m = mask.astype(jnp.float32)[:, None]
        cnt = mask.sum().astype(jnp.float32)
        mean = jnp.sum(sp * m, axis=0) / jnp.maximum(cnt, 1.0)
        return jnp.where(cnt > 0, scale * mean, 0.0)

    return (group_term(pp, alpha)
            + group_term(pn, 1.0 - alpha - beta)
            + group_term(nn_, beta))


if __name__ == "__main__":
    key = jax.random.PRNGKey(0)
    k1, k2, k3, k4 = jax.random.split(key, 4)

    # Small but ragged problem (70 pairs x 300-dim diff): exercises the no-pad
    # path (ragged rows AND columns), the in-kernel tail-row mask, and — with
    # small explicit tiles — a multi-step accumulator grid.
    N, D = 70, 300
    diff = jax.random.normal(k1, (N, D), dtype=jnp.float32)
    sign = jnp.sign(jax.random.normal(k2, (N, D), dtype=jnp.float32))
    sign = jnp.where(sign == 0.0, 1.0, sign)
    labels1 = jax.random.bernoulli(k3, 0.5, (N,)).astype(jnp.int32)
    labels2 = jax.random.bernoulli(k4, 0.5, (N,)).astype(jnp.int32)

    ref = jax.block_until_ready(_tcbb_loss_ref(diff, labels1, labels2, sign))

    # 1) Multi-step grid with ragged tail rows/columns (grid (3, 3)).
    out_tiled = jax.block_until_ready(
        tcbb_loss(diff, labels1, labels2, sign,
                  tile_n=32, tile_d=128, min_elems_for_pallas=0))
    # 2) Default (clamped) tiles: grid (2, 1) -> >=2 D tiles for v7x cores.
    out_default = jax.block_until_ready(
        tcbb_loss(diff, labels1, labels2, sign, min_elems_for_pallas=0))
    # 3) Reduced input dtypes read natively (bf16 diff, int8 sign).
    diff_bf16 = diff.astype(jnp.bfloat16)
    sign_i8 = sign.astype(jnp.int8)
    ref_bf16 = jax.block_until_ready(
        _tcbb_loss_ref(diff_bf16.astype(jnp.float32), labels1, labels2, sign))
    out_bf16 = jax.block_until_ready(
        tcbb_loss(diff_bf16, labels1, labels2, sign_i8, min_elems_for_pallas=0))

    assert out_tiled.shape == (D,) and out_default.shape == (D,)
    assert jnp.allclose(out_tiled, ref, atol=1e-5, rtol=1e-5)
    assert jnp.allclose(out_default, ref, atol=1e-5, rtol=1e-5)
    assert jnp.allclose(out_bf16, ref_bf16, atol=1e-4, rtol=1e-4)

    print("KERNEL_OK")
</pallas_src>

<mosaic_0001>
module attributes {stable_mosaic.version = 11 : i64} {
  func.func @_tcbb_kernel(%arg0: i32, %arg1: i32, %arg2: memref<32x1xf32, #tpu.memory_space<vmem>>, %arg3: memref<32x128xf32, #tpu.memory_space<vmem>>, %arg4: memref<32x128xf32, #tpu.memory_space<vmem>>, %arg5: memref<1x128xf32, #tpu.memory_space<vmem>>, %arg6: memref<8x128xf32, #tpu.memory_space<vmem>>) attributes {dimension_semantics = [#tpu.dimension_semantics<parallel>, #tpu.dimension_semantics<arbitrary>], iteration_bounds = array<i64: 3, 3>, scalar_prefetch = 0 : i64, scratch_operands = 1 : i64, tpu.core_type = #tpu.core_type<tc>, window_params = [{transform_indices = @transform_0, window_bounds = array<i64: 32, 1>}, {transform_indices = @transform_1, window_bounds = array<i64: 32, 128>}, {transform_indices = @transform_2, window_bounds = array<i64: 32, 128>}, {transform_indices = @transform_3, window_bounds = array<i64: 1, 128>}]} {
    %c0_i32 = arith.constant 0 : i32
    %0 = arith.cmpi eq, %arg1, %c0_i32 : i32
    %1 = arith.extui %0 : i1 to i32
    %c0_i32_0 = arith.constant 0 : i32
    %2 = arith.cmpi ne, %1, %c0_i32_0 : i32
    scf.if %2 {
      %cst_14 = arith.constant 0.000000e+00 : f32
      %47 = vector.broadcast %cst_14 : f32 to vector<8x128xf32>
      %c0_15 = arith.constant 0 : index
      %c0_16 = arith.constant 0 : index
      %48 = vector.load %arg6[%c0_15, %c0_16] : memref<8x128xf32, #tpu.memory_space<vmem>>, vector<8x128xf32>
      tpu.vector_store %arg6[%c0_15, %c0_16], %47 {strides = array<i32>} : memref<8x128xf32, #tpu.memory_space<vmem>>, vector<8x128xf32>,
    } else {
    }
    %c32_i32 = arith.constant 32 : i32
    %3 = arith.muli %arg1, %c32_i32 : i32
    %c70_i32 = arith.constant 70 : i32
    %4 = arith.subi %c70_i32, %3 : i32
    %5 = tpu.iota {dimensions = array<i32: 0>} : vector<32x128xi32>
    %cst = arith.constant 0.000000e+00 : f32
    %6 = vector.broadcast %cst : f32 to vector<8x128xf32>
    %c0_i32_1 = arith.constant 0 : i32
    %c32_i32_2 = arith.constant 32 : i32
    %7 = arith.muli %c0_i32_1, %c32_i32_2 : i32
    %8 = tpu.assume_multiple %7, 32 : i32
    %9 = arith.index_cast %8 : i32 to index
    %c0 = arith.constant 0 : index
    %10 = vector.load %arg3[%9, %c0] : memref<32x128xf32, #tpu.memory_space<vmem>>, vector<32x128xf32>
    %11 = arith.index_cast %8 : i32 to index
    %c0_3 = arith.constant 0 : index
    %12 = vector.load %arg4[%11, %c0_3] : memref<32x128xf32, #tpu.memory_space<vmem>>, vector<32x128xf32>
    %cst_4 = arith.constant 0.000000e+00 : f32
    %13 = vector.broadcast %cst_4 : f32 to vector<32x128xf32>
    %14 = arith.subf %13, %10 : vector<32x128xf32>
    %15 = arith.mulf %14, %12 : vector<32x128xf32>
    %cst_5 = arith.constant 0.000000e+00 : f32
    %16 = vector.broadcast %cst_5 : f32 to vector<32x128xf32>
    %17 = arith.maximumf %15, %16 : vector<32x128xf32>
    %18 = math.absf %15 : vector<32x128xf32>
    %cst_6 = arith.constant 0.000000e+00 : f32
    %19 = vector.broadcast %cst_6 : f32 to vector<32x128xf32>
    %20 = arith.subf %19, %18 : vector<32x128xf32>
    %21 = math.exp %20 : vector<32x128xf32>
    %22 = math.log1p %21 : vector<32x128xf32>
    %23 = arith.addf %17, %22 : vector<32x128xf32>
    %24 = arith.index_cast %8 : i32 to index
    %c0_7 = arith.constant 0 : index
    %25 = vector.load %arg2[%24, %c0_7] : memref<32x1xf32, #tpu.memory_space<vmem>>, vector<32x1xf32>
    %26 = vector.broadcast %25 : vector<32x1xf32> to vector<32x128xf32>
    %27 = arith.mulf %26, %23 : vector<32x128xf32>
    %28 = arith.subi %4, %8 : i32
    %29 = vector.broadcast %28 : i32 to vector<32x128xi32>
    %30 = arith.cmpi slt, %5, %29 : vector<32x128xi32>
    %cst_8 = arith.constant 0.000000e+00 : f32
    %31 = vector.broadcast %cst_8 : f32 to vector<32x128xf32>
    %32 = arith.select %30, %27, %31 : vector<32x128xi1>, vector<32x128xf32>
    %33 = vector.extract_strided_slice %32 {offsets = [0, 0], sizes = [8, 128], strides = [1, 1]} : vector<32x128xf32> to vector<8x128xf32>
    %34 = vector.extract_strided_slice %32 {offsets = [8, 0], sizes = [8, 128], strides = [1, 1]} : vector<32x128xf32> to vector<8x128xf32>
    %35 = arith.addf %33, %34 : vector<8x128xf32>
    %36 = vector.extract_strided_slice %32 {offsets = [16, 0], sizes = [8, 128], strides = [1, 1]} : vector<32x128xf32> to vector<8x128xf32>
    %37 = arith.addf %35, %36 : vector<8x128xf32>
    %38 = vector.extract_strided_slice %32 {offsets = [24, 0], sizes = [8, 128], strides = [1, 1]} : vector<32x128xf32> to vector<8x128xf32>
    %39 = arith.addf %37, %38 : vector<8x128xf32>
    %40 = arith.addf %6, %39 : vector<8x128xf32>
    %c1_i32 = arith.constant 1 : i32
    %c0_9 = arith.constant 0 : index
    %c0_10 = arith.constant 0 : index
    %41 = vector.load %arg6[%c0_9, %c0_10] : memref<8x128xf32, #tpu.memory_space<vmem>>, vector<8x128xf32>
    %42 = arith.addf %41, %40 : vector<8x128xf32>
    %c0_11 = arith.constant 0 : index
    %c0_12 = arith.constant 0 : index
    %43 = vector.load %arg6[%c0_11, %c0_12] : memref<8x128xf32, #tpu.memory_space<vmem>>, vector<8x128xf32>
    tpu.vector_store %arg6[%c0_11, %c0_12], %42 {strides = array<i32>} : memref<8x128xf32, #tpu.memory_space<vmem>>, vector<8x128xf32>,
    %c2_i32 = arith.constant 2 : i32
    %44 = arith.cmpi eq, %arg1, %c2_i32 : i32
    %45 = arith.extui %44 : i1 to i32
    %c0_i32_13 = arith.constant 0 : i32
    %46 = arith.cmpi ne, %45, %c0_i32_13 : i32
    scf.if %46 {
      %c0_14 = arith.constant 0 : index
      %c0_15 = arith.constant 0 : index
      %47 = vector.load %arg6[%c0_14, %c0_15] : memref<8x128xf32, #tpu.memory_space<vmem>>, vector<8x128xf32>
      %cst_16 = arith.constant dense<0.000000e+00> : vector<128xf32>
      %48 = vector.multi_reduction <add>, %47, %cst_16 [0] : vector<8x128xf32> to vector<128xf32>
      %49 = vector.shape_cast %48 : vector<128xf32> to vector<1x128xf32>
      %c0_17 = arith.constant 0 : index
      %c0_18 = arith.constant 0 : index
      %50 = vector.load %arg5[%c0_17, %c0_18] : memref<1x128xf32, #tpu.memory_space<vmem>>, vector<1x128xf32>
      tpu.vector_store %arg5[%c0_17, %c0_18], %49 {strides = array<i32>} : memref<1x128xf32, #tpu.memory_space<vmem>>, vector<1x128xf32>,
    } else {
    }
    return
  }
  func.func @transform_0(%arg0: i32, %arg1: i32) -> (i32, i32) {
    %c0_i32 = arith.constant 0 : i32
    %c0_i32_0 = arith.constant 0 : i32
    return %arg1, %c0_i32 : i32, i32
  }
  func.func @transform_1(%arg0: i32, %arg1: i32) -> (i32, i32) {
    %c0_i32 = arith.constant 0 : i32
    return %arg1, %arg0 : i32, i32
  }
  func.func @transform_2(%arg0: i32, %arg1: i32) -> (i32, i32) {
    %c0_i32 = arith.constant 0 : i32
    return %arg1, %arg0 : i32, i32
  }
  func.func @transform_3(%arg0: i32, %arg1: i32) -> (i32, i32) {
    %c0_i32 = arith.constant 0 : i32
    %c0_i32_0 = arith.constant 0 : i32
    return %c0_i32, %arg0 : i32, i32
  }
}

</mosaic_0001>

<bundles_post_ra>
// kernel: tpu_custom_call.1
= control target key start
LH: loop header
LB: loop body
LE: loop exit
PB: predicated region body
PF: predicated region fallthrough
CT: control target
= control target key end

     0   :  { %8 = vsyncpa [#allocation4], 0  ;;  %s1296_s0 = inlined_call_operand.vmem [shape: f32[70,1], index: 0, kind: input, shape index: {}]   ;;  %s1297_s1 = inlined_call_operand.hbm [shape: f32[70,300], index: 1, kind: input, shape index: {}]   ;;  %s1298_s2 = inlined_call_operand.hbm [shape: f32[70,300], index: 2, kind: input, shape index: {}]   ;;  %s1299_s3 = inlined_call_operand.hbm [shape: f32[1,300], index: 3, kind: output, shape index: {}]  }
   0x1   :  { %10 = vsyncpa [#allocation4 + $0x1], 0 }
   0x2   :  { %11 = vsyncpa [#allocation7], 0 }
   0x3   :  { %13 = vsyncpa [#allocation7 + $0x1], 0 }
   0x4   :  { %14 = vsyncpa [#allocation5], 0 }
   0x5   :  { %16 = vsyncpa [#allocation5 + $0x1], 0  ;;  %s983_s12 = smov 0   ;;  %s985_s13 = smov 0  }
   0x6   :  { %s987_s14 = smov 0   ;;  %s989_s15 = smov 0  }
   0x7   :  { %s991_s16 = smov 0   ;;  %s993_s17 = smov 0  }
   0x8   :  { %s995_s18 = smov 0   ;;  %s997_s19 = smov 0  }
   0x9   :  { %s999_s20 = smov 0   ;;  %s1001_s21 = smov 0  }
   0xa   :  { %s1003_s22 = smov 0  }
   0xb LB: > { %1305 = sst [smem:[#allocation12_spill]] %s911_s12  ;;  %s592_s23 = sadd.s32 4294967295, %s951_s22   ;;  %s951_s22 = sphi %s1003_s22, %s22_s22   ;;  %s947_s21 = sphi %s1001_s21, %s1339_s21   ;;  %s943_s20 = sphi %s999_s20, %s1338_s20   ;;  %s939_s19 = sphi %s997_s19, %s1337_s19   ;;  %s935_s18 = sphi %s995_s18, %s1336_s18   ;;  %s931_s17 = sphi %s993_s17, %s1335_s17   ;;  %s927_s16 = sphi %s991_s16, %s1334_s16   ;;  %s923_s15 = sphi %s989_s15, %s1333_s15   ;;  %s919_s14 = sphi %s987_s14, %s1327_s14   ;;  %s915_s13 = sphi %s985_s13, %s1332_s13   ;;  %s911_s12 = sphi %s983_s12, %s1331_s12  }
   0xc   : > { %1306 = sst [smem:[#allocation13_spill]] %s919_s14  ;;  %s593_s24 = sadd.s32 4294967294, %s951_s22  }
   0xd   : > { %s31_s25 = sadd.s32 1, %s943_s20  ;;  %s34_s26 = sadd.s32 1, %s947_s21 }
   0xe   : > { %p32_p0 = scmp.ge.s32.totalorder %s31_s25, 3  ;;  %s69_s27 = sadd.s32 1, %s931_s17 }
   0xf   : > { %p76_p1 = scmp.ne.s32.totalorder %s931_s17, %s927_s16  ;;  %p77_p2 = scmp.eq.s32.totalorder %s951_s22, 0 }
  0x10   : > { %s1341_s25 = smov (%p32_p0, %s31_s25), 0  ;;  %s1343_s26 = smov (!%p32_p0, %s34_s26), %s947_s21 }
  0x11   : > { %1307 = sst [smem:[#allocation14_spill]] %s1341_s25  ;;  %s64_s28 = ssub.s32 %s943_s20, %s1341_s25 }
  0x12   : > { %p1049_p3 = por %p77_p2, %p76_p1  ;;  %p36_p4 = scmp.ge.s32.totalorder %s1343_s26, 3 }
  0x13   : > { %p82_p5 = scmp.ne.s32.totalorder %s927_s16, %s923_s15  ;;  %p83_p6 = scmp.eq.s32.totalorder %s592_s23, 0 }
  0x14   : > { %s123_s30 = sadd.s32 1, %s919_s14  ;;  %s1345_s26 = smov (%p36_p4, %s1343_s26), 0 }
  0x15   : > { %1309 = sst [smem:[#allocation15_spill]] %s1345_s26  ;;  %p1057_p7 = por %p83_p6, %p82_p5 }
  0x16   : > { %p133_p8 = scmp.ne.s32.totalorder %s919_s14, %s915_s13  ;;  %s65_s5 = ssub.s32 %s947_s21, %s1345_s26 }
  0x17   : > { %p134_p9 = scmp.eq.s32.totalorder %s592_s23, 8  ;;  %s66_s6 = sor.u32 %s65_s5, %s64_s28 }
  0x18   : > { %p121_p10 = scmp.eq.s32.totalorder %s65_s5, 0  ;;  %p67_p11 = scmp.eq.s32.totalorder %s66_s6, 0 }
  0x19   : > { %p1065_p12 = por %p134_p9, %p133_p8  ;;  %p139_p13 = scmp.ne.s32.totalorder %s915_s13, %s911_s12 }
  0x1a   : > { %s1070_s8 = scalar_select %p121_p10, %s919_s14, %s123_s30  }
  0x1b   : > { %s1073_s9 = scalar_select %p67_p11, %s931_s17, %s69_s27  }
  0x1c   : > { %1312 = sst [smem:[#allocation16_spill]] %s1070_s8  ;;  %p140_p0 = scmp.eq.s32.totalorder %s593_s24, 8 }
  0x1d   : > { %1313 = sst [smem:[#allocation17_spill]] %s1073_s9  ;;  %p595_p2 = scmp.ge.s32.totalorder %s951_s22, 9 }
  0x1e   : > { %p1077_p1 = por %p140_p0, %p139_p13 }
  0x1f   : > { %156 = sbr.rel (%p595_p2) target bundleno = 116 (0x74), region = 16 }
  0x20   : > { %s1314_s10 = scalar_select %p1077_p1, 1, 0 }
  0x22   : > { %1315 = sst [smem:[#allocation18_spill]] %s1314_s10 }
  0x24   : > { %176 = sbr.rel (!%p1049_p3) target bundleno = 76 (0x4c), region = 24  ;;  %s177_s11 = sand.u32 (%p1049_p3), 1, %s931_s17  }
  0x25   : > { %s597_s15 = sshll.u32 (%p1049_p3), %s943_s20, 2  ;;  %s596_s23 = sshll.u32 (%p1049_p3), %s177_s11, 5 }
  0x26   : > { %s183_s28 = ssub.s32 (%p1049_p3), 9, %s597_s15  ;;  %s1089_s5 = scalar_lea.sflag (%p1049_p3), [#allocation4], %s177_s11 }
  0x27   : > { %p184_p4 = scmp.lt.s32.totalorder (%p1049_p3), %s183_s28, 4  ;;  %s181_s6 = scalar_lea.vmem (%p1049_p3), [#allocation3], %s596_s23 }
  0x29   : > { %s1347_s28 = smov (!%p184_p4, %s183_s28), 4 }
  0x2a   : > { %s598_s24 = sshll.u32 %s1347_s28, 3 }
  0x2b   : > { %s187_s27 = ssub.s32 32, %s598_s24 }
  0x2c   : > { %s188_s30 = sshll.u32 %s187_s27, 4 }
  0x2d   : > { %189 = vsyncadd %s1089_s5, %s188_s30  ;;  %p1092_p5 = scmp.ne.s32.totalorder %s598_s24, 0  ;;  %s622_s15 = smul.u32 12, %s943_s20 }
  0x2e   : > { %s1097_s25 = sshll.u32 %s181_s6, 4  ;;  %s603_s9 = sshll.u32 %s1347_s28, 7  ;;  %s199_s25 = int_to_ptr.vmem [resolvable:$true] %s1097_s25 }
  0x2f   : > { %s192_s27 = sadd.s32 %s947_s21, %s622_s15  ;;  %s749_s10 = sshrl.u32 %s603_s9, 4 }
  0x30   : > { %s601_s11 = sshll.u32 %s192_s27, 3  ;;  %s758_s27 = scalar_lea.hbm %s1297_s1, 216 }
  0x31   : > { %s194_s30 = scalar_lea.hbm %s1297_s1, %s601_s11 }
  0x32   : > { %s196_s14 = sshll.u32 %s194_s30, 4  ;;  %s1105_s14 = int_to_ptr.hbm [resolvable:$true] %s196_s14 }
  0x33   : > { %s747_s24 = sshra.s32 %s1105_s14, 4  ;;  %s748_s24 = int_to_ptr.hbm [resolvable:$true] %s747_s24 }
  0x34   : > { %s754_s12 = scalar_lea.hbm %s748_s24, %s749_s10 }
  0x35   : > { %p755_p6 = scmp.ne.s32.totalorder %s748_s24, %s754_s12  ;;  %p760_p10 = scmp.lt.s32.totalorder %s758_s27, %s754_s12 }
  0x37   : > { %p756_p8 = pnand %p755_p6, %p1092_p5 }
  0x39   : > { %p757_p9 = pneg %p756_p8 }
  0x3b   : > { %p762_p11 = pnand %p760_p10, %p757_p9 }
  0x3d   : > { %765 = shalt.err (!%p762_p11)
}
  0x3e   : > { %s766_s8 = sshra.s32 %s199_s25, 4  ;;  %s953_s23 = smov [#allocation3]   ;;  %s767_s8 = int_to_ptr.vmem [resolvable:$true] %s766_s8 }
  0x3f   : > { %s773_s11 = scalar_lea.vmem %s767_s8, %s749_s10  ;;  %s777_s30 = scalar_lea.vmem %s953_s23, 64 }
  0x40   : > { %p774_p13 = scmp.ne.s32.totalorder %s767_s8, %s773_s11  ;;  %p779_p4 = scmp.lt.s32.totalorder %s777_s30, %s773_s11 }
  0x42   : > { %p775_p0 = pnand %p774_p13, %p1092_p5 }
  0x44   : > { %p776_p2 = pneg %p775_p0 }
  0x46   : > { %p781_p6 = pnand %p779_p4, %p776_p2 }
  0x48   : > { %784 = shalt.err (!%p781_p6)
}
  0x49   : > { %s954_s24 = smov 384   ;;  %s955_s12 = smov 128  }
  0x4a   : > { %s956_s6 = smov 8  }
  0x4b   : > { %204 = dma.hbm_to_vmem [thread:$0]  (%p1092_p5), %s1105_s14, %s603_s9, %s199_s25, %s1089_s5, %s954_s24, %s955_s12, %s956_s6  }
  0x4c PF: > { %207 = sbr.rel (!%p1049_p3) target bundleno = 116 (0x74), region = 28  ;;  %s208_s10 = sand.u32 (%p1049_p3), 1, %s931_s17  }
  0x4d   : > { %s605_s15 = sshll.u32 (%p1049_p3), %s943_s20, 2  ;;  %s604_s27 = sshll.u32 (%p1049_p3), %s208_s10, 5 }
  0x4e   : > { %s214_s8 = ssub.s32 (%p1049_p3), 9, %s605_s15  ;;  %s1134_s30 = scalar_lea.sflag (%p1049_p3), [#allocation7], %s208_s10 }
  0x4f   : > { %p215_p8 = scmp.lt.s32.totalorder (%p1049_p3), %s214_s8, 4  ;;  %s212_s14 = scalar_lea.vmem (%p1049_p3), [#allocation6], %s604_s27 }
  0x51   : > { %s1349_s8 = smov (!%p215_p8, %s214_s8), 4 }
  0x52   : > { %s606_s11 = sshll.u32 %s1349_s8, 3 }
  0x53   : > { %s218_s23 = ssub.s32 32, %s606_s11 }
  0x54   : > { %s219_s26 = sshll.u32 %s218_s23, 4 }
  0x55   : > { %220 = vsyncadd %s1134_s30, %s219_s26  ;;  %p1137_p3 = scmp.ne.s32.totalorder %s606_s11, 0  ;;  %s623_s29 = smul.u32 12, %s943_s20 }
  0x56   : > { %s1142_s9 = sshll.u32 %s212_s14, 4  ;;  %s611_s28 = sshll.u32 %s1349_s8, 7  ;;  %s230_s9 = int_to_ptr.vmem [resolvable:$true] %s1142_s9 }
  0x57   : > { %s223_s5 = sadd.s32 %s947_s21, %s623_s29  ;;  %s788_s11 = sshrl.u32 %s611_s28, 4 }
  0x58   : > { %s609_s24 = sshll.u32 %s223_s5, 3  ;;  %s797_s29 = scalar_lea.hbm %s1298_s2, 216 }
  0x59   : > { %s225_s10 = scalar_lea.hbm %s1298_s2, %s609_s24 }
  0x5a   : > { %s227_s15 = sshll.u32 %s225_s10, 4  ;;  %s1150_s15 = int_to_ptr.hbm [resolvable:$true] %s227_s15 }
  0x5b   : > { %s786_s27 = sshra.s32 %s1150_s15, 4  ;;  %s787_s27 = int_to_ptr.hbm [resolvable:$true] %s786_s27 }
  0x5c   : > { %s793_s23 = scalar_lea.hbm %s787_s27, %s788_s11 }
  0x5d   : > { %p794_p5 = scmp.ne.s32.totalorder %s787_s27, %s793_s23  ;;  %p799_p11 = scmp.lt.s32.totalorder %s797_s29, %s793_s23 }
  0x5f   : > { %p795_p9 = pnand %p794_p5, %p1137_p3 }
  0x61   : > { %p796_p10 = pneg %p795_p9 }
  0x63   : > { %p801_p13 = pnand %p799_p11, %p796_p10 }
  0x65   : > { %804 = shalt.err (!%p801_p13)
}
  0x66   : > { %s805_s5 = sshra.s32 %s230_s9, 4  ;;  %s957_s12 = smov [#allocation6]   ;;  %s806_s5 = int_to_ptr.vmem [resolvable:$true] %s805_s5 }
  0x67   : > { %s812_s24 = scalar_lea.vmem %s806_s5, %s788_s11  ;;  %s816_s6 = scalar_lea.vmem %s957_s12, 64 }
  0x68   : > { %p813_p0 = scmp.ne.s32.totalorder %s806_s5, %s812_s24  ;;  %p818_p6 = scmp.lt.s32.totalorder %s816_s6, %s812_s24 }
  0x6a   : > { %p814_p2 = pnand %p813_p0, %p1137_p3 }
  0x6c   : > { %p815_p4 = pneg %p814_p2 }
  0x6e   : > { %p820_p8 = pnand %p818_p6, %p815_p4 }
  0x70   : > { %823 = shalt.err (!%p820_p8)
}
  0x71   : > { %s958_s10 = smov 384   ;;  %s959_s27 = smov 128  }
  0x72   : > { %s960_s23 = smov 8  }
  0x73   : > { %235 = dma.hbm_to_vmem [thread:$0]  (%p1137_p3), %s1150_s15, %s611_s28, %s230_s9, %s1134_s30, %s958_s10, %s959_s27, %s960_s23  }
  0x74 PF: > { %p612_p5 = scmp.ge.s32.totalorder %s951_s22, 1  ;;  %p237_p9 = scmp.lt.s32.totalorder %s951_s22, 10 }
  0x76   : > { %p238_p10 = pnand %p612_p5, %p237_p9 }
  0x77   : > { %s243_s11 = sand.u32 (!%p238_p10), 1, %s927_s16  }
  0x78   : > { %241 = sbr.rel (%p238_p10) target bundleno = 310 (0x136), region = 32  ;;  %s613_s26 = sshll.u32 (!%p238_p10), %s243_s11, 5 }
  0x79   : > { %s244_s14 = scalar_lea.sflag (!%p238_p10), [#allocation4], %s243_s11  ;;  %s1175_s29 = scalar_lea.vmem (!%p238_p10), [#allocation3], %s613_s26 }
  0x7d   : > { %898 = dma.done.wait (%p1057_p7), %s244_s14, 512  }
  0x7e   : > { %900 = vsyncadd (%p1057_p7), %s244_s14, 4294966784  ;;  %s254_s8 = scalar_lea.sflag [#allocation7], %s243_s11  ;;  %s1181_s30 = scalar_lea.vmem [#allocation6], %s613_s26 }
  0x7f   : > { %902 = dma.done.wait (%p1057_p7), %s254_s8, 512  }
  0x80   : > { %904 = vsyncadd (%p1057_p7), %s254_s8, 4294966784  ;;  %s292_s25 = sand.u32 1, %s915_s13   ;;  %s615_s9 = sshll.u32 %s935_s18, 2 }
  0x81   : > { %p299_p3 = scmp.lt.s32.totalorder %s615_s9, 8  ;;  %s1194_s12 = scalar_lea.vmem [#allocation8], %s292_s25 }
  0x82   : > { %p617_p11 = scmp.ne.s32.totalorder %s935_s18, 0 }
  0x83   : > { %s1351_s9 = smov (!%p299_p3, %s615_s9), 8 }
  0x84   : > { %s616_s28 = sshll.u32 %s1351_s9, 3  ;;  %321 = sbr.rel (%p617_p11) target bundleno = 139 (0x8b), region = 44 }
  0x85   : > { %s302_s24 = scalar_lea.vmem %s1296_s0, %s616_s28 }
  0x89   : > { %v961_v0 = vmov 0.0  }
  0x8a   : > { %322 = vst [vmem:[#allocation2] sm:$0xff] %v961_v0 }
  0x8b PF: > { %v408_v1 = vld [vmem:[%s302_s24 + $0x10] sm:$0xff]  ;;  %v406_v2 = vld [vmem:[%s302_s24] sm:$0xff]  ;;  %v962_v3 = vmov 0   ;;  %v409_v4 = vld [vmem:[%s302_s24 + $0x18] sm:$0xff]  ;;  %v325_v59 = vlaneseq  ;;  %s618_s4 = sshll.u32 %s935_s18, 5  ;;  %p619_p7 = scmp.ne.s32.totalorder %s935_s18, 2 }
  0x8c   : > { %730 = vset.pattern.permute.xlu1 %v962_v3  ;;  %729 = vset.pattern.permute.xlu0 %v962_v3  ;;  %v407_v5 = vld [vmem:[%s302_s24 + $0x8] sm:$0xff]  ;;  %v332_v7 = vld [vmem:[%s1175_s29 + $0x10] sm:$0xff]  ;;  %v331_v8 = vld [vmem:[%s1175_s29 + $0x8] sm:$0xff]  ;;  %s324_s6 = ssub.s32 70, %s618_s4 }
  0x8d   : > { %422 = vperm.xlu1 %730, %v408_v1   ;;  %412 = vperm.xlu0 %729, %v406_v2   ;;  %v330_v6 = vld [vmem:[%s1175_s29] sm:$0xff]  ;;  %v340_v10 = vsub.f32 0.0, %v332_v7  ;;  %v333_v12 = vld [vmem:[%s1175_s29 + $0x18] sm:$0xff]  ;;  %v336_v13 = vld [vmem:[%s1181_s30 + $0x10] sm:$0xff]  ;;  %v339_v14 = vsub.f32 0.0, %v331_v8 }
  0x8e   : > { %v338_v9 = vsub.f32 0.0, %v330_v6  ;;  %v334_v11 = vld [vmem:[%s1181_s30] sm:$0xff]  ;;  %v335_v15 = vld [vmem:[%s1181_s30 + $0x8] sm:$0xff]  ;;  %v341_v17 = vsub.f32 0.0, %v333_v12  ;;  %v337_v19 = vld [vmem:[%s1181_s30 + $0x18] sm:$0xff]  ;;  %v326_v12 = vshrl.u32 %v325_v59, 7 }
  0x8f   : > { %v1206_v18 = vmul.f32 %v340_v10, %v336_v13  ;;  %v1209_v20 = vmul.f32 %v339_v14, %v335_v15 }
  0x90   : > { %v1204_v16 = vmul.f32 %v338_v9, %v334_v11  ;;  %v1212_v22 = vmul.f32 %v341_v17, %v337_v19  ;;  %v327_v19 = vadd.s32 8, %v326_v12 }
  0x91   : > { %v352_v23 = vand.u32 2147483647, %v1206_v18  ;;  %v351_v24 = vand.u32 2147483647, %v1209_v20  ;;  %v348_v10 = vmax.f32 %v1206_v18, 0.0  ;;  %v347_v11 = vmax.f32 %v1209_v20, 0.0 }
  0x92   : > { %v350_v21 = vand.u32 2147483647, %v1204_v16  ;;  %v353_v26 = vand.u32 2147483647, %v1212_v22  ;;  %v346_v3 = vmax.f32 %v1204_v16, 0.0  ;;  %v349_v16 = vmax.f32 %v1212_v22, 0.0 }
  0x93   : > { %v356_v27 = vsub.f32 0.0, %v352_v23  ;;  %v355_v28 = vsub.f32 0.0, %v351_v24  ;;  %v435_v23 = vstv %s324_s6  ;;  %v328_v18 = vadd.s32 16, %v326_v12 }
  0x94   : > { %v354_v25 = vsub.f32 0.0, %v350_v21  ;;  %v357_v30 = vsub.f32 0.0, %v353_v26  ;;  %vm436_vm4 = vcmp.lt.s32.totalorder %v326_v12, %v435_v23  ;;  %vm437_vm5 = vcmp.lt.s32.totalorder %v327_v19, %v435_v23 }
  0x95   : > { %427 = vperm.xlu1 %730, %v409_v4   ;;  %417 = vperm.xlu0 %729, %v407_v5   ;;  %v362_v31 = vmul.f32 1.442695, %v356_v27  ;;  %v360_v32 = vmul.f32 1.442695, %v355_v28  ;;  %v329_v27 = vadd.s32 24, %v326_v12  ;;  %vm438_vm6 = vcmp.lt.s32.totalorder %v328_v18, %v435_v23 }
  0x96   : > { %v358_v29 = vmul.f32 1.442695, %v354_v25  ;;  %v364_v33 = vmul.f32 1.442695, %v357_v30 }
  0x97   : > { %vm439_vm7 = vcmp.lt.s32.totalorder %v329_v27, %v435_v23 }
  0x98   : > { %731 = vpow2.f32 %v358_v29 }
  0x99   : > { %733 = vpow2.f32 %v362_v31 }
  0x9a   : > { %735 = vpow2.f32 %v360_v32 }
  0x9b   : > { %737 = vpow2.f32 %v364_v33 }
  0x9e   : > { %v732_v34 = vpop.eup %731 }
  0x9f   : > { %v734_v35 = vpop.eup %733  ;;  %v366_v37 = vadd.f32 1.0, %v732_v34  ;;  %v369_v42 = vmul.f32 -0.5, %v732_v34  ;;  %v372_v48 = vand.u32 2147483647, %v732_v34 }
  0xa0   : > { %v736_v36 = vpop.eup %735  ;;  %v384_v39 = vadd.f32 1.0, %v734_v35  ;;  %v387_v43 = vmul.f32 -0.5, %v734_v35  ;;  %v390_v53 = vand.u32 2147483647, %v734_v35 }
  0xa1   : > { %v738_v38 = vpop.eup %737  ;;  %v375_v40 = vadd.f32 1.0, %v736_v36  ;;  %739 = vlog2.f32 %v366_v37  ;;  %v378_v44 = vmul.f32 -0.5, %v736_v36  ;;  %v370_v45 = vadd.f32 1.0, %v369_v42  ;;  %v448_v37 = vld [vmem:[#allocation2] sm:$0xff] }
  0xa2   : > { %v393_v41 = vadd.f32 1.0, %v738_v38  ;;  %741 = vlog2.f32 %v384_v39  ;;  %v396_v46 = vmul.f32 -0.5, %v738_v38  ;;  %v388_v50 = vadd.f32 1.0, %v387_v43 }
  0xa3   : > { %743 = vlog2.f32 %v375_v40  ;;  %v379_v51 = vadd.f32 1.0, %v378_v44  ;;  %v381_v54 = vand.u32 2147483647, %v736_v36  ;;  %v371_v56 = vmul.f32 %v732_v34, %v370_v45 }
  0xa4   : > { %745 = vlog2.f32 %v393_v41  ;;  %v397_v57 = vadd.f32 1.0, %v396_v46  ;;  %vm1217_vm0 = vcmp.lt.f32.partialorder %v372_v48, 0.0004427343  ;;  %v399_v61 = vand.u32 2147483647, %v738_v38 }
  0xa5   : > { %v389_v63 = vmul.f32 %v734_v35, %v388_v50  ;;  %v380_v1 = vmul.f32 %v736_v36, %v379_v51  ;;  %vm1222_vm1 = vcmp.lt.f32.partialorder %v390_v53, 0.0004427343  ;;  %vm1227_vm2 = vcmp.lt.f32.partialorder %v381_v54, 0.0004427343 }
  0xa6   : > { %v398_v9 = vmul.f32 %v738_v38, %v397_v57  ;;  %vm400_vm3 = vcmp.lt.f32.partialorder %v399_v61, 0.0004427343 }
  0xa7   : > { %v740_v47 = vpop.eup %739 }
  0xa8   : > { %v742_v49 = vpop.eup %741  ;;  %v368_v55 = vmul.f32 0.6931472, %v740_v47 }
  0xa9   : > { %v744_v52 = vpop.eup %743  ;;  %v386_v62 = vmul.f32 0.6931472, %v742_v49 }
  0xaa   : > { %v746_v58 = vpop.eup %745  ;;  %v377_v0 = vmul.f32 0.6931472, %v744_v52  ;;  %v374_v7 = vsel %vm1217_vm0, %v371_v56, %v368_v55 }
  0xab   : > { %v395_v8 = vmul.f32 0.6931472, %v746_v58  ;;  %v392_v13 = vsel %vm1222_vm1, %v389_v63, %v386_v62  ;;  %v402_v15 = vadd.f32 %v374_v7, %v346_v3 }
  0xac   : > { %v383_v14 = vsel %vm1227_vm2, %v380_v1, %v377_v0  ;;  %v404_v21 = vadd.f32 %v392_v13, %v348_v10 }
  0xad   : > { %v401_v17 = vsel %vm400_vm3, %v398_v9, %v395_v8  ;;  %v403_v24 = vadd.f32 %v383_v14, %v347_v11 }
  0xae   : > { %v405_v26 = vadd.f32 %v401_v17, %v349_v16 }
  0xff   : > { %v423_v5 = vpop.permute.xlu1 %422  ;;  %v413_v6 = vpop.permute.xlu0 %412 }
 0x100   : > { %v430_v25 = vmul.f32 %v413_v6, %v402_v15  ;;  %v432_v29 = vmul.f32 %v423_v5, %v404_v21 }
 0x102   : > { %v440_v31 = vsel %vm436_vm4, %v430_v25, 0.0  ;;  %v442_v34 = vsel %vm438_vm6, %v432_v29, 0.0 }
 0x107   : > { %v428_v20 = vpop.permute.xlu1 %427  ;;  %v418_v28 = vpop.permute.xlu0 %417 }
 0x108   : > { %v431_v30 = vmul.f32 %v418_v28, %v403_v24  ;;  %v433_v32 = vmul.f32 %v428_v20, %v405_v26 }
 0x10a   : > { %v441_v33 = vsel %vm437_vm5, %v431_v30, 0.0  ;;  %v443_v36 = vsel %vm439_vm7, %v433_v32, 0.0 }
 0x10b   : > { %v444_v22 = vadd.f32 %v441_v33, %v440_v31 }
 0x10d   : > { %v445_v35 = vadd.f32 %v444_v22, %v442_v34 }
 0x10f   : > { %v446_v38 = vadd.f32 %v445_v35, %v443_v36  ;;  %454 = sbr.rel (%p619_p7) target bundleno = 296 (0x128), region = 48 }
 0x111   : > { %v449_v39 = vadd.f32 %v448_v37, %v446_v38 }
 0x113   : > { %450 = vst [vmem:[#allocation2] sm:$0xff] %v449_v39 }
 0x11a   : > { %v455_v40 = vld [vmem:[#allocation2] sm:$0xff] }
 0x11b   : > { %v456_v41 = vrot.slane %v455_v40, 4 }
 0x11d   : > { %v457_v42 = vadd.f32 %v456_v41, %v455_v40 }
 0x11f   : > { %v458_v43 = vrot.slane %v457_v42, 2 }
 0x121   : > { %v459_v44 = vadd.f32 %v458_v43, %v457_v42 }
 0x123   : > { %v460_v45 = vrot.slane %v459_v44, 1 }
 0x125   : > { %v461_v46 = vadd.f32 %v460_v45, %v459_v44 }
 0x127   : > { %462 = vst [vmem:[%s1194_s12] sm:$0x1] %v461_v46 }
 0x128 PF: > { %s472_s23 = scalar_lea.hbm %s1299_s3, %s939_s19  ;;  %s474_s18 = sshll.u32 %s1194_s12, 4  ;;  %s475_s18 = int_to_ptr.vmem [resolvable:$true] %s474_s18 }
 0x129   : > { %s476_s11 = sshll.u32 %s472_s23, 4  ;;  %s464_s26 = scalar_lea.sflag [#allocation5], %s292_s25  ;;  %s477_s11 = int_to_ptr.hbm [resolvable:$true] %s476_s11 }
 0x12a   : > { %s839_s14 = sshra.s32 %s477_s11, 4  ;;  %s845_s9 = scalar_lea.hbm %s1299_s3, 3  ;;  %s840_s14 = int_to_ptr.hbm [resolvable:$true] %s839_s14 }
 0x12b   : > { %s841_s29 = scalar_lea.hbm %s840_s14, 1  ;;  %p846_p4 = scmp.lt.s32.totalorder %s840_s14, %s1299_s3 }
 0x12c   : > { %p842_p13 = scmp.ne.s32.totalorder %s840_s14, %s841_s29  ;;  %p847_p6 = scmp.lt.s32.totalorder %s845_s9, %s841_s29 }
 0x12e   : > { %p843_p0 = pnand %p842_p13, %p1065_p12  ;;  %p848_p8 = por %p847_p6, %p846_p4 }
 0x130   : > { %p844_p2 = pneg %p843_p0 }
 0x132   : > { %p849_p5 = pnand %p848_p8, %p844_p2 }
 0x134   : > { %852 = shalt.err (!%p849_p5)
}
 0x135   : > { %626 = dma.vmem_to_hbm [thread:$0]  (%p1065_p12), %s475_s18, 16, %s477_s11, %s464_s26  }
 0x136 PF: > { %s1324_s19 = sld [smem:[#allocation12_spill]]  ;;  %p632_p9 = scmp.ge.s32.totalorder %s951_s22, 2 }
 0x138   : > { %p629_p10 = pnand %p632_p9, %p1077_p1 }
 0x13a   : > { %p630_p3 = pneg %p629_p10 }
 0x13c   : > { %s488_s5 = sand.u32 1, %s1324_s19  }
 0x13d   : > { %s489_s24 = scalar_lea.sflag [#allocation5], %s488_s5 }
 0x13e   : > { %906 = dma.done.wait (%p630_p3), %s489_s24, 16  }
 0x13f   : > { %908 = vsyncadd (%p630_p3), %s489_s24, 4294967280  ;;  %s22_s22 = sadd.s32 1, %s951_s22   ;;  %s1326_s4 = sld [smem:[#allocation13_spill]] }
 0x140   : > { %p19_p11 = scmp.ge.s32.totalorder %s22_s22, 11   ;;  %s1327_s14 = sld [smem:[#allocation16_spill]] }
 0x141   : > { %s1328_s7 = sld [smem:[#allocation17_spill]]  ;;  %s1331_s12 = smov %s915_s13 }
 0x142   : > { %s1329_s6 = sld [smem:[#allocation14_spill]]  ;;  %s1333_s15 = smov %s927_s16 }
 0x143   : > { %s1330_s10 = sld [smem:[#allocation15_spill]]  ;;  %s1334_s16 = smov %s931_s17 }
 0x144   : > { %s1336_s18 = smov %s943_s20  ;;  %s1337_s19 = smov %s947_s21 }
 0x145   : > { %s1332_s13 = smov %s1326_s4  ;;  %21 = sbr.rel (!%p19_p11) target bundleno = 11 (0xb), region = 101 }
 0x147   : > { %s1335_s17 = smov %s1328_s7 }
 0x148   : > { %s1338_s20 = smov %s1329_s6 }
 0x149   : > { %s1339_s21 = smov %s1330_s10 }
 0x14a   :  { %494 = vsyncpa [#allocation4], 1 }
 0x14b   :  { %496 = vsyncpa [#allocation4 + $0x1], 1 }
 0x14c   :  { %497 = vsyncpa [#allocation7], 1 }
 0x14d   :  { %499 = vsyncpa [#allocation7 + $0x1], 1 }
 0x14e   :  { %500 = vsyncpa [#allocation5], 1 }
 0x14f   :  { %502 = vsyncpa [#allocation5 + $0x1], 1 }

</bundles_post_ra>
